<compile_context>
chip_gen: v5e
topology: v5e:2x2
jax: 0.10.0
libtpu: 0.0.40
codegen_flags: <defaults>
</compile_context>

<pallas_src>
import functools

import jax
import jax.numpy as jnp
from jax.experimental import pallas as pl
from jax.experimental.pallas import tpu as pltpu

_LANE = 128
_SUBLANE = 8
_BLOCK_ROWS = 8192                      # f32: 8192*128*4 B = 4 MiB / input block
_VMEM_LIMIT_BYTES = 48 * 1024 * 1024    # > v5e's 16 MiB default, < v7x's 64 MiB
_SMALL_N_CUTOFF = 1 << 20               # below this, plain XLA reduction wins


@functools.lru_cache(maxsize=None)
def _num_tensorcores():
    """Best-effort TensorCore count per chip (2 on v7x, 1 on v5e/v6e).

    Falls back to 1 (always safe and correct) if the probe is unavailable."""
    try:
        info = pltpu.get_tpu_info()
    except Exception:
        return 1
    for name in ("tensorcore_count", "num_tensorcores", "num_cores",
                 "core_count", "cores_per_chip", "num_cores_per_chip"):
        val = getattr(info, name, None)
        if isinstance(val, int) and 1 <= val <= 8:
            return val
    return 1


def _tversky_partial_kernel(x_ref, t_ref, out_ref, *, rows, block_rows,
                            nblocks, blocks_per_slice, num_slices, needs_mask):
    """Accumulates per-(8,128)-vreg partial sums of x*t, x, t into
    out_ref[(1, 3, 8, 128)], which stays VMEM-resident across the reduction
    grid axis."""
    if num_slices > 1:
        c = pl.program_id(0)          # core slice axis (CORE_PARALLEL)
        i = pl.program_id(1)          # reduction axis (ARBITRARY)
        blk = c * blocks_per_slice + i
    else:
        i = pl.program_id(0)          # reduction axis (ARBITRARY)
        blk = i

    @pl.when(i == 0)
    def _():
        out_ref[...] = jnp.zeros_like(out_ref)

    sub = block_rows // _SUBLANE

    def accumulate(x, t):
        # (block_rows, 128) -> (8, 128): pure elementwise vreg adds on the
        # VPU; no cross-lane XLU work inside the hot loop.
        x3 = x.reshape(sub, _SUBLANE, _LANE)
        t3 = t.reshape(sub, _SUBLANE, _LANE)
        out_ref[0, 0, :, :] += (x3 * t3).sum(axis=0)
        out_ref[0, 1, :, :] += x3.sum(axis=0)
        out_ref[0, 2, :, :] += t3.sum(axis=0)

    if needs_mask:
        # Only the final (possibly partial) block and any clamped overflow
        # blocks pay for the row mask; interior blocks take the fast path.
        @pl.when(blk < nblocks - 1)
        def _():
            accumulate(x_ref[...].astype(jnp.float32),
                       t_ref[...].astype(jnp.float32))

        @pl.when(blk >= nblocks - 1)
        def _():
            remaining = rows - blk * block_rows   # <= 0 for overflow blocks
            row_ids = jax.lax.broadcasted_iota(jnp.int32, (block_rows, 1), 0)
            valid = row_ids < remaining
            # jnp.where selects before use, so garbage in OOB rows cannot leak.
            x = jnp.where(valid, x_ref[...].astype(jnp.float32), 0.0)
            t = jnp.where(valid, t_ref[...].astype(jnp.float32), 0.0)
            accumulate(x, t)
    else:
        accumulate(x_ref[...].astype(jnp.float32),
                   t_ref[...].astype(jnp.float32))


def _tversky_partial_sums(x2, t2):
    """x2, t2: (rows, 128) with rows a multiple of 8.
    Returns f32[3] = [sum(x*t), sum(x), sum(t)]."""
    rows = x2.shape[0]
    block_rows = min(_BLOCK_ROWS, rows)            # both multiples of 8
    nblocks = pl.cdiv(rows, block_rows)

    # Only shard across TensorCores when the chip really has >1 TC and there
    # is more than one block of work; otherwise a 1-D grid is strictly better
    # (no clamped duplicate HBM read, no mask work on exact-fit inputs).
    num_slices = 2 if (nblocks > 1 and _num_tensorcores() >= 2) else 1
    blocks_per_slice = pl.cdiv(nblocks, num_slices)
    needs_mask = (blocks_per_slice * num_slices * block_rows) != rows

    kernel = functools.partial(
        _tversky_partial_kernel,
        rows=rows, block_rows=block_rows, nblocks=nblocks,
        blocks_per_slice=blocks_per_slice, num_slices=num_slices,
        needs_mask=needs_mask)

    if num_slices > 1:
        grid = (num_slices, blocks_per_slice)

        def in_index_map(c, i):
            # Clamp so the DMA never targets a nonexistent block; the in-kernel
            # row mask zeroes any clamped / out-of-range contribution.
            return (jnp.minimum(c * blocks_per_slice + i, nblocks - 1), 0)

        out_spec = pl.BlockSpec((1, 3, _SUBLANE, _LANE),
                                lambda c, i: (c, 0, 0, 0))
        dim_sem = (pltpu.CORE_PARALLEL, pltpu.ARBITRARY)
    else:
        grid = (blocks_per_slice,)

        def in_index_map(i):
            return (i, 0)

        out_spec = pl.BlockSpec((1, 3, _SUBLANE, _LANE),
                                lambda i: (0, 0, 0, 0))
        dim_sem = (pltpu.ARBITRARY,)

    n_elems = rows * _LANE
    cost = pl.CostEstimate(
        flops=4 * n_elems,
        transcendentals=0,
        bytes_accessed=int(n_elems * (x2.dtype.itemsize + t2.dtype.itemsize)),
    )

    partials = pl.pallas_call(
        kernel,
        out_shape=jax.ShapeDtypeStruct(
            (num_slices, 3, _SUBLANE, _LANE), jnp.float32),
        grid_spec=pltpu.PrefetchScalarGridSpec(
            num_scalar_prefetch=0,
            grid=grid,
            in_specs=[
                pl.BlockSpec((block_rows, _LANE), in_index_map),
                pl.BlockSpec((block_rows, _LANE), in_index_map),
            ],
            out_specs=out_spec,
        ),
        compiler_params=pltpu.CompilerParams(
            dimension_semantics=dim_sem,
            vmem_limit_bytes=_VMEM_LIMIT_BYTES,
        ),
        cost_estimate=cost,
    )(x2, t2)

    # Single cross-lane / cross-sublane reduction, outside the kernel.
    return jnp.sum(partials, axis=(0, 2, 3))


def tversky_loss(inputs, targets, smooth=1.0, alpha=0.5, beta=0.5, *,
                 force_pallas=False):
    """Matches TverskyLoss.forward(inputs, targets, smooth, alpha, beta)."""
    x = inputs.reshape(-1)
    t = targets.reshape(-1)
    n = x.shape[0]

    if n < _SMALL_N_CUTOFF and not force_pallas:
        # pallas_call launch/grid/tail overhead dominates small inputs; XLA's
        # fused reduction is strictly faster there.
        xf = x.astype(jnp.float32)
        tf = t.astype(jnp.float32)
        TP = jnp.sum(xf * tf)
        FP = jnp.sum((1.0 - tf) * xf)
        FN = jnp.sum(tf * (1.0 - xf))
    else:
        tile = _SUBLANE * _LANE
        rows = (n // tile) * _SUBLANE    # rows handled by kernel (multiple of 8)
        n_main = rows * _LANE

        # Tail (< 1024 elements) in plain JAX -- negligible, and avoids any
        # padding copy of the full arrays (zero copies when n % 1024 == 0).
        x_tail = x[n_main:].astype(jnp.float32)
        t_tail = t[n_main:].astype(jnp.float32)
        tail = jnp.stack(
            [jnp.sum(x_tail * t_tail), jnp.sum(x_tail), jnp.sum(t_tail)])

        if rows > 0:
            sums = _tversky_partial_sums(
                x[:n_main].reshape(rows, _LANE),
                t[:n_main].reshape(rows, _LANE)) + tail
        else:
            sums = tail

        s_xt, s_x, s_t = sums[0], sums[1], sums[2]
        TP = s_xt
        FP = s_x - s_xt            # sum((1 - t) * x)
        FN = s_t - s_xt            # sum(t * (1 - x))

    tversky = (TP + smooth) / (TP + alpha * FP + beta * FN + smooth)
    return 1.0 - tversky


def _tversky_ref(inputs, targets, smooth=1.0, alpha=0.5, beta=0.5):
    x = inputs.reshape(-1).astype(jnp.float32)
    t = targets.reshape(-1).astype(jnp.float32)
    TP = jnp.sum(x * t)
    FP = jnp.sum((1.0 - t) * x)
    FN = jnp.sum(t * (1.0 - x))
    return 1.0 - (TP + smooth) / (TP + alpha * FP + beta * FN + smooth)


if __name__ == "__main__":
    key = jax.random.PRNGKey(0)
    k1, k2, k3, k4, k5, k6 = jax.random.split(key, 6)

    # Small NCHW segmentation-style inputs: batch=2, channels=4, 16x16.
    inputs = jax.nn.sigmoid(jax.random.normal(k1, (2, 4, 16, 16), jnp.float32))
    targets = (jax.random.uniform(k2, (2, 4, 16, 16)) > 0.5).astype(jnp.float32)

    ref = _tversky_ref(inputs, targets)
    loss_fast = jax.block_until_ready(tversky_loss(inputs, targets))
    loss_kernel = jax.block_until_ready(
        tversky_loss(inputs, targets, force_pallas=True))
    assert jnp.allclose(loss_fast, ref, atol=1e-5, rtol=1e-5), (loss_fast, ref)
    assert jnp.allclose(loss_kernel, ref, atol=1e-5, rtol=1e-5), (loss_kernel, ref)

    # Ragged size (not a multiple of 1024) -> exercises kernel + JAX tail sum.
    inputs2 = jax.nn.sigmoid(jax.random.normal(k3, (2, 4, 33, 16), jnp.float32))
    targets2 = (jax.random.uniform(k4, (2, 4, 33, 16)) > 0.5).astype(jnp.float32)
    ref2 = _tversky_ref(inputs2, targets2)
    loss2 = jax.block_until_ready(
        tversky_loss(inputs2, targets2, force_pallas=True))
    assert jnp.allclose(loss2, ref2, atol=1e-5, rtol=1e-5), (loss2, ref2)

    # Larger case: multi-block grid, masked final block (and both TCs on v7x).
    inputs3 = jax.nn.sigmoid(
        jax.random.normal(k5, (4, 4, 384, 384), jnp.float32))
    targets3 = (jax.random.uniform(k6, (4, 4, 384, 384)) > 0.5
                ).astype(jnp.float32)
    ref3 = _tversky_ref(inputs3, targets3)
    loss3 = jax.block_until_ready(tversky_loss(inputs3, targets3))
    assert jnp.allclose(loss3, ref3, atol=1e-5, rtol=1e-5), (loss3, ref3)

    print("KERNEL_OK")
</pallas_src>

<mosaic_0001>
module attributes {stable_mosaic.version = 11 : i64} {
  func.func @_tversky_partial_kernel(%arg0: i32, %arg1: memref<16x128xf32, #tpu.memory_space<vmem>>, %arg2: memref<16x128xf32, #tpu.memory_space<vmem>>, %arg3: memref<1x3x8x128xf32, #tpu.memory_space<vmem>>) attributes {dimension_semantics = [#tpu.dimension_semantics<arbitrary>], iteration_bounds = array<i64: 1>, scalar_prefetch = 0 : i64, scratch_operands = 0 : i64, tpu.core_type = #tpu.core_type<tc>, window_params = [{transform_indices = @transform_0, window_bounds = array<i64: 16, 128>}, {transform_indices = @transform_1, window_bounds = array<i64: 16, 128>}, {pipeline_mode = #tpu.pipeline_mode<synchronous>, transform_indices = @transform_2, window_bounds = array<i64: 1, 3, 8, 128>}]} {
    %c0_i32 = arith.constant 0 : i32
    %0 = arith.cmpi eq, %arg0, %c0_i32 : i32
    %1 = arith.extui %0 : i1 to i32
    %c0_i32_0 = arith.constant 0 : i32
    %2 = arith.cmpi ne, %1, %c0_i32_0 : i32
    scf.if %2 {
      %cst_28 = arith.constant 0.000000e+00 : f32
      %29 = vector.broadcast %cst_28 : f32 to vector<1x3x8x128xf32>
      %c0_29 = arith.constant 0 : index
      %c0_30 = arith.constant 0 : index
      %c0_31 = arith.constant 0 : index
      %c0_32 = arith.constant 0 : index
      %30 = vector.load %arg3[%c0_29, %c0_30, %c0_31, %c0_32] : memref<1x3x8x128xf32, #tpu.memory_space<vmem>>, vector<1x3x8x128xf32>
      tpu.vector_store %arg3[%c0_29, %c0_30, %c0_31, %c0_32], %29 {strides = array<i32>} : memref<1x3x8x128xf32, #tpu.memory_space<vmem>>, vector<1x3x8x128xf32>,
    } else {
    }
    %c0 = arith.constant 0 : index
    %c0_1 = arith.constant 0 : index
    %3 = vector.load %arg1[%c0, %c0_1] : memref<16x128xf32, #tpu.memory_space<vmem>>, vector<16x128xf32>
    %c0_2 = arith.constant 0 : index
    %c0_3 = arith.constant 0 : index
    %4 = vector.load %arg2[%c0_2, %c0_3] : memref<16x128xf32, #tpu.memory_space<vmem>>, vector<16x128xf32>
    %5 = vector.shape_cast %3 : vector<16x128xf32> to vector<2x8x128xf32>
    %6 = vector.shape_cast %4 : vector<16x128xf32> to vector<2x8x128xf32>
    %c0_4 = arith.constant 0 : index
    %c0_5 = arith.constant 0 : index
    %c0_6 = arith.constant 0 : index
    %c0_7 = arith.constant 0 : index
    %7 = vector.load %arg3[%c0_4, %c0_5, %c0_6, %c0_7] : memref<1x3x8x128xf32, #tpu.memory_space<vmem>>, vector<1x1x8x128xf32>
    %8 = vector.shape_cast %7 : vector<1x1x8x128xf32> to vector<8x128xf32>
    %9 = arith.mulf %5, %6 : vector<2x8x128xf32>
    %cst = arith.constant dense<0.000000e+00> : vector<8x128xf32>
    %10 = vector.multi_reduction <add>, %9, %cst [0] : vector<2x8x128xf32> to vector<8x128xf32>
    %11 = arith.addf %8, %10 : vector<8x128xf32>
    %c0_8 = arith.constant 0 : index
    %c0_9 = arith.constant 0 : index
    %c0_10 = arith.constant 0 : index
    %c0_11 = arith.constant 0 : index
    %12 = vector.load %arg3[%c0_8, %c0_9, %c0_10, %c0_11] : memref<1x3x8x128xf32, #tpu.memory_space<vmem>>, vector<1x1x8x128xf32>
    %13 = vector.shape_cast %12 : vector<1x1x8x128xf32> to vector<8x128xf32>
    %14 = vector.shape_cast %11 : vector<8x128xf32> to vector<1x1x8x128xf32>
    tpu.vector_store %arg3[%c0_8, %c0_9, %c0_10, %c0_11], %14 {strides = array<i32>} : memref<1x3x8x128xf32, #tpu.memory_space<vmem>>, vector<1x1x8x128xf32>,
    %c0_12 = arith.constant 0 : index
    %c1 = arith.constant 1 : index
    %c0_13 = arith.constant 0 : index
    %c0_14 = arith.constant 0 : index
    %15 = vector.load %arg3[%c0_12, %c1, %c0_13, %c0_14] : memref<1x3x8x128xf32, #tpu.memory_space<vmem>>, vector<1x1x8x128xf32>
    %16 = vector.shape_cast %15 : vector<1x1x8x128xf32> to vector<8x128xf32>
    %cst_15 = arith.constant dense<0.000000e+00> : vector<8x128xf32>
    %17 = vector.multi_reduction <add>, %5, %cst_15 [0] : vector<2x8x128xf32> to vector<8x128xf32>
    %18 = arith.addf %16, %17 : vector<8x128xf32>
    %c0_16 = arith.constant 0 : index
    %c1_17 = arith.constant 1 : index
    %c0_18 = arith.constant 0 : index
    %c0_19 = arith.constant 0 : index
    %19 = vector.load %arg3[%c0_16, %c1_17, %c0_18, %c0_19] : memref<1x3x8x128xf32, #tpu.memory_space<vmem>>, vector<1x1x8x128xf32>
    %20 = vector.shape_cast %19 : vector<1x1x8x128xf32> to vector<8x128xf32>
    %21 = vector.shape_cast %18 : vector<8x128xf32> to vector<1x1x8x128xf32>
    tpu.vector_store %arg3[%c0_16, %c1_17, %c0_18, %c0_19], %21 {strides = array<i32>} : memref<1x3x8x128xf32, #tpu.memory_space<vmem>>, vector<1x1x8x128xf32>,
    %c0_20 = arith.constant 0 : index
    %c2 = arith.constant 2 : index
    %c0_21 = arith.constant 0 : index
    %c0_22 = arith.constant 0 : index
    %22 = vector.load %arg3[%c0_20, %c2, %c0_21, %c0_22] : memref<1x3x8x128xf32, #tpu.memory_space<vmem>>, vector<1x1x8x128xf32>
    %23 = vector.shape_cast %22 : vector<1x1x8x128xf32> to vector<8x128xf32>
    %cst_23 = arith.constant dense<0.000000e+00> : vector<8x128xf32>
    %24 = vector.multi_reduction <add>, %6, %cst_23 [0] : vector<2x8x128xf32> to vector<8x128xf32>
    %25 = arith.addf %23, %24 : vector<8x128xf32>
    %c0_24 = arith.constant 0 : index
    %c2_25 = arith.constant 2 : index
    %c0_26 = arith.constant 0 : index
    %c0_27 = arith.constant 0 : index
    %26 = vector.load %arg3[%c0_24, %c2_25, %c0_26, %c0_27] : memref<1x3x8x128xf32, #tpu.memory_space<vmem>>, vector<1x1x8x128xf32>
    %27 = vector.shape_cast %26 : vector<1x1x8x128xf32> to vector<8x128xf32>
    %28 = vector.shape_cast %25 : vector<8x128xf32> to vector<1x1x8x128xf32>
    tpu.vector_store %arg3[%c0_24, %c2_25, %c0_26, %c0_27], %28 {strides = array<i32>} : memref<1x3x8x128xf32, #tpu.memory_space<vmem>>, vector<1x1x8x128xf32>,
    return
  }
  func.func @transform_0(%arg0: i32) -> (i32, i32) {
    %c0_i32 = arith.constant 0 : i32
    %c0_i32_0 = arith.constant 0 : i32
    return %arg0, %c0_i32 : i32, i32
  }
  func.func @transform_1(%arg0: i32) -> (i32, i32) {
    %c0_i32 = arith.constant 0 : i32
    %c0_i32_0 = arith.constant 0 : i32
    return %arg0, %c0_i32 : i32, i32
  }
  func.func @transform_2(%arg0: i32) -> (i32, i32, i32, i32) {
    %c0_i32 = arith.constant 0 : i32
    %c0_i32_0 = arith.constant 0 : i32
    %c0_i32_1 = arith.constant 0 : i32
    %c0_i32_2 = arith.constant 0 : i32
    %c0_i32_3 = arith.constant 0 : i32
    return %c0_i32, %c0_i32_0, %c0_i32_1, %c0_i32_2 : i32, i32, i32, i32
  }
}

</mosaic_0001>

<bundles_post_ra>
// kernel: tpu_custom_call.1
= control target key start
LH: loop header
LB: loop body
LE: loop exit
PB: predicated region body
PF: predicated region fallthrough
CT: control target
= control target key end

     0   :  { %7 = vsyncpa [#allocation3], 0  ;;  %s213_s0 = inlined_call_operand.hbm [shape: f32[16,128], index: 0, kind: input, shape index: {}]   ;;  %s214_s1 = inlined_call_operand.hbm [shape: f32[16,128], index: 1, kind: input, shape index: {}]   ;;  %s215_s2 = inlined_call_operand.hbm [shape: f32[1,3,8,128], index: 2, kind: output, shape index: {}]  }
   0x1   :  { %8 = vsyncpa [#allocation6], 0 }
   0x2   :  { %9 = vsyncpa [#allocation4], 0  ;;  %s14_s11 = sshll.u32 %s213_s0, 4  ;;  %s175_s12 = smov [#allocation2]   ;;  %s15_s11 = int_to_ptr.hbm [resolvable:$true] %s14_s11 }
   0x3   :  { %s16_s13 = sshll.u32 %s175_s12, 4  ;;  %s27_s16 = sshll.u32 %s214_s1, 4  ;;  %s17_s13 = int_to_ptr.vmem [resolvable:$true] %s16_s13  ;;  %s28_s16 = int_to_ptr.hbm [resolvable:$true] %s27_s16 }
   0x4   :  { %s176_s17 = smov 128   ;;  %s177_s18 = smov 8  }
   0x5   :  { %22 = dma.hbm_to_vmem [thread:$0]  %s15_s11, 256, %s17_s13, [#allocation3], %s176_s17, %s176_s17, %s177_s18  }
   0x6   :  { %s178_s19 = smov [#allocation5]  }
   0x7   :  { %s29_s20 = sshll.u32 %s178_s19, 4  ;;  %s30_s20 = int_to_ptr.vmem [resolvable:$true] %s29_s20 }
   0x8   :  { %35 = dma.hbm_to_vmem [thread:$0]  %s28_s16, 256, %s30_s20, [#allocation6], %s176_s17, %s176_s17, %s177_s18  }
   0x9   :  { %169 = dma.done.wait [#allocation3], 256  }
   0xa   :  { %170 = vsyncadd [#allocation3], 4294967040 }
   0xb   :  { %171 = dma.done.wait [#allocation6], 256  }
   0xc   :  { %172 = vsyncadd [#allocation6], 4294967040  ;;  %v51_v0 = vld [vmem:[#allocation2] sm:$0xff]  ;;  %v52_v1 = vld [vmem:[#allocation2 + $0x8] sm:$0xff]  ;;  %s179_s0 = smov [#allocation7]   ;;  %s77_s23 = sshll.u32 %s215_s2, 4  ;;  %s78_s23 = int_to_ptr.hbm [resolvable:$true] %s77_s23 }
   0xd   :  { %v53_v2 = vld [vmem:[#allocation5] sm:$0xff]  ;;  %v54_v3 = vld [vmem:[#allocation5 + $0x8] sm:$0xff]  ;;  %v63_v5 = vadd.f32 %v52_v1, %v51_v0  ;;  %s75_s1 = sshll.u32 %s179_s0, 4  ;;  %s76_s1 = int_to_ptr.vmem [resolvable:$true] %s75_s1 }
   0xe   :  { %v56_v4 = vmul.f32 %v53_v2, %v51_v0  ;;  %v57_v6 = vmul.f32 %v54_v3, %v52_v1  ;;  %v68_v7 = vadd.f32 %v54_v3, %v53_v2 }
   0xf   :  { %65 = vst [vmem:[#allocation7 + $0x8] sm:$0xff] %v63_v5 }
  0x10   :  { %v58_v8 = vadd.f32 %v57_v6, %v56_v4  ;;  %70 = vst [vmem:[#allocation7 + $0x10] sm:$0xff] %v68_v7 }
  0x12   :  { %60 = vst [vmem:[#allocation7] sm:$0xff] %v58_v8 }
  0x13   :  { %83 = dma.vmem_to_hbm [thread:$0]  %s76_s1, 384, %s78_s23, [#allocation4], %s176_s17, %s176_s17, %s177_s18  }
  0x14   :  { %173 = dma.done.wait [#allocation4], 384  }
  0x15   :  { %174 = vsyncadd [#allocation4], 4294966912 }
  0x16   :  { %88 = vsyncpa [#allocation3], 1 }
  0x17   :  { %89 = vsyncpa [#allocation6], 1 }
  0x18   :  { %90 = vsyncpa [#allocation4], 1 }

</bundles_post_ra>
